<compile_context>
chip_gen: v5e
topology: v5e:2x2
jax: 0.10.0
libtpu: 0.0.40
codegen_flags: <defaults>
</compile_context>

<pallas_src>
import functools

import jax
import jax.numpy as jnp
from jax.experimental import pallas as pl
from jax.experimental.pallas import tpu as pltpu


# ---- Problem sizes (CartPole-like env) --------------------------------------
N_STATES = 4        # env.observation_space.shape[0]
N_ACTIONS = 2       # env.action_space.n
HIDDEN = 10         # fc1 out_features

# ---- Packed-parameter-slab / output layout -----------------------------------
LANES = 128
GROUP = 8           # output lanes per net: [q0, q1, argmax, maxQ, 0, 0, 0, 0]
HID_STRIDE = 16     # hidden lanes reserved per net (HIDDEN=10 padded to 16)
ROW_W1 = 0          # rows 0:4               W1 (all nets, disjoint lane blocks)
ROW_B1 = N_STATES   # row 4                  b1
ROW_B2 = N_STATES + 1  # row 5               augmented b2
ROW_W2 = 8          # rows 8 : 8+16*n_nets   augmented W2
LANE_Q0, LANE_Q1, LANE_ARG, LANE_MAX = 0, 1, 2, 3


def _round_up(n, m):
    return ((n + m - 1) // m) * m


def pack_nets(*param_sets, dtype=jnp.float32):
    """Pack n nets' params into ONE zero-padded (8 + 16*n, 128) slab.

    Per net n (hb = n*HID_STRIDE, lb = n*GROUP):
      rows 0:4,        lanes hb:hb+10 : W1        (n_states, hidden)
      row  4,          lanes hb:hb+10 : b1
      row  5,          lanes lb:lb+4  : [b2_0, b2_1, (b2_1-b2_0)/2, (b2_0+b2_1)/2]
      rows 8+hb:+10,   lanes lb:lb+4  : [w2[:,0], w2[:,1],
                                         (w2[:,1]-w2[:,0])/2, (w2[:,0]+w2[:,1])/2]
    The extra half-diff / half-sum columns let the kernel derive the greedy
    argmax and max-Q without lane reductions.  Call once per optimizer step /
    target-net sync and reuse the slab across forwards.
    """
    n_nets = len(param_sets)
    assert n_nets >= 1
    assert n_nets * HID_STRIDE <= LANES and n_nets * GROUP <= LANES
    rows = ROW_W2 + n_nets * HID_STRIDE          # multiple of 8
    slab = jnp.zeros((rows, LANES), dtype)
    for n, (w1, b1, w2, b2) in enumerate(param_sets):
        w1 = jnp.asarray(w1, jnp.float32)
        b1 = jnp.reshape(jnp.asarray(b1, jnp.float32), (HIDDEN,))
        w2 = jnp.asarray(w2, jnp.float32)
        b2 = jnp.reshape(jnp.asarray(b2, jnp.float32), (N_ACTIONS,))
        hb, lb = n * HID_STRIDE, n * GROUP
        w2_aug = jnp.stack(
            [w2[:, 0], w2[:, 1],
             0.5 * (w2[:, 1] - w2[:, 0]), 0.5 * (w2[:, 0] + w2[:, 1])], axis=1)
        b2_aug = jnp.stack(
            [b2[0], b2[1], 0.5 * (b2[1] - b2[0]), 0.5 * (b2[0] + b2[1])])
        slab = slab.at[ROW_W1:ROW_W1 + N_STATES, hb:hb + HIDDEN].set(w1.astype(dtype))
        slab = slab.at[ROW_B1, hb:hb + HIDDEN].set(b1.astype(dtype))
        slab = slab.at[ROW_B2, lb:lb + 4].set(b2_aug.astype(dtype))
        slab = slab.at[ROW_W2 + hb:ROW_W2 + hb + HIDDEN, lb:lb + 4].set(
            w2_aug.astype(dtype))
    return slab


def _make_kernel(n_nets, compute_dtype):
    hid_tot = n_nets * HID_STRIDE
    out_lanes = n_nets * GROUP

    def kernel(x_ref, p_ref, o_ref):
        tb = x_ref.shape[0]
        x = x_ref[...].astype(compute_dtype)                              # (tb, 4)
        w1 = p_ref[ROW_W1:ROW_W1 + N_STATES, :].astype(compute_dtype)     # (4, 128)
        b1 = p_ref[ROW_B1:ROW_B1 + 1, :].astype(jnp.float32)              # (1, 128)
        b2 = p_ref[ROW_B2:ROW_B2 + 1, :].astype(jnp.float32)              # (1, 128)
        w2 = p_ref[ROW_W2:ROW_W2 + hid_tot, :].astype(compute_dtype)      # (hid_tot, 128)

        # fc1 + ReLU for ALL packed nets in one MXU pass (zero padding => exact;
        # lanes outside each net's 10 hidden units stay exactly 0 after ReLU).
        h = jnp.maximum(
            jnp.dot(x, w1, preferred_element_type=jnp.float32) + b1, 0.0)  # (tb, 128)

        # Output layer for ALL nets in one MXU pass; only the hid_tot populated
        # hidden lanes are contracted (W2 slab is 16 rows per net, not 128).
        q = jnp.dot(h[:, :hid_tot].astype(compute_dtype), w2,
                    preferred_element_type=jnp.float32) + b2               # (tb, 128)

        # Fused greedy action selection with NO lane reductions:
        #   lane lb+2 of q already holds (q1-q0)/2  -> argmax = (q1 > q0), tie -> 0
        #   lane lb+3 of q already holds (q0+q1)/2  -> maxQ = (q0+q1)/2 + |q1-q0|/2
        # |q1-q0|/2 sits in the lane next to the maxQ lane; fetch it with two
        # opposite 1-lane rotations (direction-agnostic: the other neighbour,
        # lane lb+4, is exactly 0 by construction).
        absq = jnp.abs(q)
        nbr = pltpu.roll(absq, 1, 1) + pltpu.roll(absq, LANES - 1, 1)
        lane = jax.lax.broadcasted_iota(jnp.int32, (tb, LANES), 1)
        sub = lane & (GROUP - 1)
        used = lane < out_lanes
        out = jnp.where((sub == LANE_ARG) & used,
                        jnp.where(q > 0.0, 1.0, 0.0), q)
        out = jnp.where((sub == LANE_MAX) & used, q + nbr, out)
        o_ref[...] = out.astype(o_ref.dtype)   # single lane-dense (tb,128) store

    return kernel


@functools.partial(jax.jit, static_argnames=("block_b", "compute_dtype"))
def net_forward(x, slab, *, block_b=256, compute_dtype=jnp.float32):
    """Fused forward for all nets packed in `slab` over one batch x.

    x: (B, N_STATES) float.  slab: output of pack_nets (cache it across calls).
    Returns one (q, greedy_action, max_q) triple per packed net:
      q (B, N_ACTIONS) f32, greedy_action (B,) int32, max_q (B,) f32.
    """
    n_nets = (slab.shape[0] - ROW_W2) // HID_STRIDE
    B = x.shape[0]
    b8 = _round_up(max(B, 1), 8)
    tb = min(block_b, b8)
    if b8 >= 128:
        # Large-ish batch: force >=2 grid steps so ("parallel",) can shard the
        # batch across both v7x TensorCores (harmless elsewhere).
        tb = min(tb, _round_up((b8 + 1) // 2, 8))
    b_pad = _round_up(b8, tb)
    x_pad = x.astype(jnp.float32)
    if b_pad != B:
        x_pad = jnp.pad(x_pad, ((0, b_pad - B), (0, 0)))

    out = pl.pallas_call(
        _make_kernel(n_nets, compute_dtype),
        out_shape=jax.ShapeDtypeStruct((b_pad, LANES), jnp.float32),
        grid=(b_pad // tb,),
        in_specs=[
            pl.BlockSpec((tb, N_STATES), lambda i: (i, 0)),
            pl.BlockSpec((slab.shape[0], LANES), lambda i: (0, 0)),
        ],
        out_specs=pl.BlockSpec((tb, LANES), lambda i: (i, 0)),
        compiler_params=pltpu.CompilerParams(
            dimension_semantics=("parallel",)),
    )(x_pad, slab)

    results = []
    for n in range(n_nets):
        lb = n * GROUP
        q = out[:B, lb + LANE_Q0:lb + LANE_Q1 + 1]
        action = out[:B, lb + LANE_ARG].astype(jnp.int32)
        max_q = out[:B, lb + LANE_MAX]
        results.append((q, action, max_q))
    return results


def init_params(key):
    """Mirror the PyTorch module: weights ~ Normal(0, 0.1); biases use the
    PyTorch Linear default Uniform(-1/sqrt(fan_in), 1/sqrt(fan_in))."""
    k1, k2, k3, k4 = jax.random.split(key, 4)
    w1 = 0.1 * jax.random.normal(k1, (N_STATES, HIDDEN), dtype=jnp.float32)
    w2 = 0.1 * jax.random.normal(k2, (HIDDEN, N_ACTIONS), dtype=jnp.float32)
    bound1 = 1.0 / jnp.sqrt(jnp.float32(N_STATES))
    bound2 = 1.0 / jnp.sqrt(jnp.float32(HIDDEN))
    b1 = jax.random.uniform(k3, (HIDDEN,), dtype=jnp.float32,
                            minval=-bound1, maxval=bound1)
    b2 = jax.random.uniform(k4, (N_ACTIONS,), dtype=jnp.float32,
                            minval=-bound2, maxval=bound2)
    return w1, b1, w2, b2


def reference_forward(x, w1, b1, w2, b2):
    h = jnp.maximum(x @ w1 + b1, 0.0)
    return h @ w2 + b2


if __name__ == "__main__":
    key = jax.random.PRNGKey(0)
    kx, ke, kt, kx2 = jax.random.split(key, 4)

    eval_params = init_params(ke)        # eval net
    target_params = init_params(kt)      # target net (fused into the same call)
    # Pack ONCE; reuse the slab for every forward until the weights change.
    slab = jax.block_until_ready(pack_nets(eval_params, target_params))

    def check(x, results, param_sets):
        for (q, a, m), p in zip(results, param_sets):
            q_ref = reference_forward(x, *p)
            assert q.shape == (x.shape[0], N_ACTIONS), q.shape
            assert jnp.allclose(q, q_ref, atol=1e-4, rtol=1e-4)
            amax = jnp.argmax(q, axis=-1).astype(jnp.int32)
            gap = jnp.abs(q[:, 0] - q[:, 1])
            assert bool(jnp.all((a == amax) | (gap < 1e-5)))
            assert jnp.allclose(m, jnp.max(q, axis=-1), atol=1e-5, rtol=1e-5)

    # Typical DQN minibatch: single grid step, both nets in one launch.
    BATCH = 32
    x = jax.random.normal(kx, (BATCH, N_STATES), dtype=jnp.float32)
    res = jax.block_until_ready(net_forward(x, slab))
    check(x, res, (eval_params, target_params))

    # Larger batch: exercises batch padding + the >=2-grid-step (dual-TC) path.
    x2 = jax.random.normal(kx2, (200, N_STATES), dtype=jnp.float32)
    res2 = jax.block_until_ready(net_forward(x2, slab))
    check(x2, res2, (eval_params, target_params))

    print("KERNEL_OK")
</pallas_src>

<mosaic_0001>
module attributes {stable_mosaic.version = 11 : i64} {
  func.func @kernel(%arg0: i32, %arg1: memref<32x4xf32, #tpu.memory_space<vmem>>, %arg2: memref<40x128xf32, #tpu.memory_space<vmem>>, %arg3: memref<32x128xf32, #tpu.memory_space<vmem>>) attributes {dimension_semantics = [#tpu.dimension_semantics<parallel>], iteration_bounds = array<i64: 1>, scalar_prefetch = 0 : i64, scratch_operands = 0 : i64, tpu.core_type = #tpu.core_type<tc>, window_params = [{transform_indices = @transform_0, window_bounds = array<i64: 32, 4>}, {pipeline_mode = #tpu.pipeline_mode<synchronous>, transform_indices = @transform_1, window_bounds = array<i64: 40, 128>}, {transform_indices = @transform_2, window_bounds = array<i64: 32, 128>}]} {
    %c0 = arith.constant 0 : index
    %c0_0 = arith.constant 0 : index
    %0 = vector.load %arg1[%c0, %c0_0] : memref<32x4xf32, #tpu.memory_space<vmem>>, vector<32x4xf32>
    %c0_1 = arith.constant 0 : index
    %c0_2 = arith.constant 0 : index
    %1 = vector.load %arg2[%c0_1, %c0_2] : memref<40x128xf32, #tpu.memory_space<vmem>>, vector<4x128xf32>
    %c4 = arith.constant 4 : index
    %c0_3 = arith.constant 0 : index
    %2 = vector.load %arg2[%c4, %c0_3] : memref<40x128xf32, #tpu.memory_space<vmem>>, vector<1x128xf32>
    %c5 = arith.constant 5 : index
    %c0_4 = arith.constant 0 : index
    %3 = vector.load %arg2[%c5, %c0_4] : memref<40x128xf32, #tpu.memory_space<vmem>>, vector<1x128xf32>
    %c8 = arith.constant 8 : index
    %c0_5 = arith.constant 0 : index
    %4 = vector.load %arg2[%c8, %c0_5] : memref<40x128xf32, #tpu.memory_space<vmem>>, vector<32x128xf32>
    %cst = arith.constant dense<0.000000e+00> : vector<32x128xf32>
    %5 = tpu.matmul %0, %1, %cst {dimension_numbers = #tpu.dot_dimension_numbers<[1], [0], [0], [1], [0, 0, 1, 1], [], []>} : vector<32x4xf32>, vector<4x128xf32>, vector<32x128xf32> -> vector<32x128xf32>
    %6 = vector.broadcast %2 : vector<1x128xf32> to vector<32x128xf32>
    %7 = arith.addf %5, %6 : vector<32x128xf32>
    %cst_6 = arith.constant 0.000000e+00 : f32
    %8 = vector.broadcast %cst_6 : f32 to vector<32x128xf32>
    %9 = arith.maximumf %7, %8 : vector<32x128xf32>
    %10 = vector.extract_strided_slice %9 {offsets = [0, 0], sizes = [32, 32], strides = [1, 1]} : vector<32x128xf32> to vector<32x32xf32>
    %cst_7 = arith.constant dense<0.000000e+00> : vector<32x128xf32>
    %11 = tpu.matmul %10, %4, %cst_7 {dimension_numbers = #tpu.dot_dimension_numbers<[1], [0], [0], [1], [0, 0, 1, 1], [], []>} : vector<32x32xf32>, vector<32x128xf32>, vector<32x128xf32> -> vector<32x128xf32>
    %12 = vector.broadcast %3 : vector<1x128xf32> to vector<32x128xf32>
    %13 = arith.addf %11, %12 : vector<32x128xf32>
    %14 = math.absf %13 : vector<32x128xf32>
    %c1_i32 = arith.constant 1 : i32
    %15 = tpu.dynamic_rotate %14 by %c1_i32 dim 1 : vector<32x128xf32>, i32 -> vector<32x128xf32>
    %c127_i32 = arith.constant 127 : i32
    %16 = tpu.dynamic_rotate %14 by %c127_i32 dim 1 : vector<32x128xf32>, i32 -> vector<32x128xf32>
    %17 = arith.addf %15, %16 : vector<32x128xf32>
    %18 = tpu.iota {dimensions = array<i32: 1>} : vector<32x128xi32>
    %c7_i32 = arith.constant 7 : i32
    %19 = vector.broadcast %c7_i32 : i32 to vector<32x128xi32>
    %20 = arith.andi %18, %19 : vector<32x128xi32>
    %c16_i32 = arith.constant 16 : i32
    %21 = vector.broadcast %c16_i32 : i32 to vector<32x128xi32>
    %22 = arith.cmpi slt, %18, %21 : vector<32x128xi32>
    %c2_i32 = arith.constant 2 : i32
    %23 = vector.broadcast %c2_i32 : i32 to vector<32x128xi32>
    %24 = arith.cmpi eq, %20, %23 : vector<32x128xi32>
    %25 = arith.andi %24, %22 : vector<32x128xi1>
    %cst_8 = arith.constant 0.000000e+00 : f32
    %26 = vector.broadcast %cst_8 : f32 to vector<32x128xf32>
    %27 = arith.cmpf ogt, %13, %26 : vector<32x128xf32>
    %cst_9 = arith.constant 1.000000e+00 : f32
    %cst_10 = arith.constant 0.000000e+00 : f32
    %28 = vector.broadcast %cst_9 : f32 to vector<32x128xf32>
    %29 = vector.broadcast %cst_10 : f32 to vector<32x128xf32>
    %30 = arith.select %27, %28, %29 : vector<32x128xi1>, vector<32x128xf32>
    %31 = arith.select %25, %30, %13 : vector<32x128xi1>, vector<32x128xf32>
    %c3_i32 = arith.constant 3 : i32
    %32 = vector.broadcast %c3_i32 : i32 to vector<32x128xi32>
    %33 = arith.cmpi eq, %20, %32 : vector<32x128xi32>
    %34 = arith.andi %33, %22 : vector<32x128xi1>
    %35 = arith.addf %13, %17 : vector<32x128xf32>
    %36 = arith.select %34, %35, %31 : vector<32x128xi1>, vector<32x128xf32>
    %c0_11 = arith.constant 0 : index
    %c0_12 = arith.constant 0 : index
    %37 = vector.load %arg3[%c0_11, %c0_12] : memref<32x128xf32, #tpu.memory_space<vmem>>, vector<32x128xf32>
    tpu.vector_store %arg3[%c0_11, %c0_12], %36 {strides = array<i32>} : memref<32x128xf32, #tpu.memory_space<vmem>>, vector<32x128xf32>,
    return
  }
  func.func @transform_0(%arg0: i32) -> (i32, i32) {
    %c0_i32 = arith.constant 0 : i32
    %c0_i32_0 = arith.constant 0 : i32
    return %arg0, %c0_i32 : i32, i32
  }
  func.func @transform_1(%arg0: i32) -> (i32, i32) {
    %c0_i32 = arith.constant 0 : i32
    %c0_i32_0 = arith.constant 0 : i32
    %c0_i32_1 = arith.constant 0 : i32
    return %c0_i32, %c0_i32_0 : i32, i32
  }
  func.func @transform_2(%arg0: i32) -> (i32, i32) {
    %c0_i32 = arith.constant 0 : i32
    %c0_i32_0 = arith.constant 0 : i32
    return %arg0, %c0_i32 : i32, i32
  }
}

</mosaic_0001>

<bundles_post_ra>
// kernel: net_forward.1
= control target key start
LH: loop header
LB: loop body
LE: loop exit
PB: predicated region body
PF: predicated region fallthrough
CT: control target
= control target key end

     0   :  { %7 = vsyncpa [#allocation3], 0  ;;  %s241_s12 = smov [#allocation2]   ;;  %s242_s14 = smov 128   ;;  %s313_s0 = inlined_call_operand.vmem [shape: f32[32,4], index: 0, kind: input, shape index: {}]   ;;  %s314_s1 = inlined_call_operand.hbm [shape: f32[40,128], index: 1, kind: input, shape index: {}]   ;;  %s315_s2 = inlined_call_operand.vmem [shape: f32[32,128], index: 2, kind: output, shape index: {}]  }
   0x1   :  { %s14_s11 = sshll.u32 %s314_s1, 4  ;;  %s16_s13 = sshll.u32 %s241_s12, 4  ;;  %s15_s11 = int_to_ptr.hbm [resolvable:$true] %s14_s11  ;;  %s17_s13 = int_to_ptr.vmem [resolvable:$true] %s16_s13 }
   0x2   :  { %s243_s15 = smov 8  }
   0x3   :  { %22 = dma.hbm_to_vmem [thread:$0]  %s15_s11, 640, %s17_s13, [#allocation3], %s242_s14, %s242_s14, %s243_s15  }
   0x4   :  { %239 = dma.done.wait [#allocation3], 640  }
   0x5   :  { %240 = vsyncadd [#allocation3], 4294966656  ;;  %vm52_vm0 = vcmask 1043456   ;;  %vm39_vm1 = vcmask 31744   ;;  %v31_v0 = vld [vmem:[#allocation2] sm:$0xf]  ;;  %v156_v35 = vlaneseq }
   0x6   :  { %v27_v1 = vld [vmem:[%s313_s0] sm:$0xff]  ;;  %v28_v2 = vld [vmem:[%s313_s0 + $0x8] sm:$0xff]  ;;  %193 = vmatpush.msk.msra.mxu0 %vm52_vm0, %v31_v0  ;;  %202 = vmatpush.msk.msra.mxu3 %vm52_vm0, %v31_v0  ;;  %v29_v4 = vld [vmem:[%s313_s0 + $0x10] sm:$0xff]  ;;  %vm90_vm2 = vcmask 261120   ;;  %s245_s23 = smov 1   ;;  %v246_v40 = vmov 0.0  }
   0x7   :  { %v37_v3 = vld [vmem:[#allocation2 + $0x20] sm:$0xff]  ;;  %194 = vmatmul.msk.f32.vlgmr.msra.gmra.mxu0 %vm39_vm1, %v27_v1  ;;  %195 = vmatmul.msk.f32.vlgmr.msra.gmra.mxu3 %vm39_vm1, %v28_v2  ;;  %v30_v5 = vld [vmem:[%s313_s0 + $0x18] sm:$0xff]  ;;  %v35_v7 = vld [vmem:[#allocation2 + $0x10] sm:$0xff]  ;;  %s244_s0 = smov 127   ;;  %v157_v36 = vand.u32 127, %v156_v35 }
   0x8   :  { %115 = vmatpush.msra.mxu1 %v37_v3  ;;  %203 = vmatpush.msra.mxu2 %v37_v3  ;;  %v36_v6 = vld [vmem:[#allocation2 + $0x18] sm:$0xff]  ;;  %v34_v8 = vld [vmem:[#allocation2 + $0x8] sm:$0xff]  ;;  %v213_v9 = vld [vmem:[#allocation2 + $0x4] ss:$0 sm:$0xff] }
   0x9   :  { %v214_v22 = vld [vmem:[#allocation2 + $0x5] ss:$0 sm:$0xff]  ;;  %v158_v37 = vand.u32 7, %v157_v36  ;;  %vm159_vm5 = vcmp.lt.s32.totalorder %v157_v36, 16 }
   0xa   :  { %116 = vmatpush.msra.mxu1 %v36_v6  ;;  %204 = vmatpush.msra.mxu2 %v36_v6 }
   0xb   :  { %vm174_vm4 = vcmp.eq.s32.totalorder %v158_v37, 3  ;;  %vm160_vm6 = vcmp.eq.s32.totalorder %v158_v37, 2 }
   0xc   :  { %117 = vmatpush.msra.mxu1 %v35_v7  ;;  %205 = vmatpush.msra.mxu2 %v35_v7  ;;  %vm277_vm7 = vmand %vm174_vm4, %vm159_vm5 }
   0xd   :  { %vm281_vm8 = vmand %vm160_vm6, %vm159_vm5 }
   0xe   :  { %118 = vmatpush.msra.mxu1 %v34_v8  ;;  %206 = vmatpush.msra.mxu2 %v34_v8 }
   0xf   :  { %196 = vmatmul.msk.f32.gmra.mxu3 %vm39_vm1, %v29_v4 }
  0x17   :  { %197 = vmatmul.msk.f32.gmra.mxu3 %vm39_vm1, %v30_v5 }
  0x84   :  { %v73_v10 = vpop.f32.mrf.mxu0 }
  0x85   :  { %v74_v11 = vadd.f32 %v213_v9, %v73_v10 }
  0x87   :  { %v85_v12 = vmax.f32 %v74_v11, 0.0 }
  0x89   :  { %198 = vmatmul.msk.f32.vlgmr.msra.gmra.mxu1 %vm90_vm2, %v85_v12 }
  0x8a   :  { %v76_v13 = vpop.f32.mrf.mxu3 }
  0x8b   :  { %v77_v14 = vadd.f32 %v213_v9, %v76_v13 }
  0x8d   :  { %v86_v15 = vmax.f32 %v77_v14, 0.0 }
  0x91   :  { %199 = vmatmul.msk.f32.gmra.mxu1 %vm90_vm2, %v86_v15 }
  0x92   :  { %v79_v16 = vpop.f32.mrf.mxu3 }
  0x93   :  { %v80_v17 = vadd.f32 %v213_v9, %v79_v16 }
  0x95   :  { %v87_v18 = vmax.f32 %v80_v17, 0.0 }
  0x97   :  { %200 = vmatmul.msk.f32.vlgmr.msra.gmra.mxu2 %vm90_vm2, %v87_v18 }
  0x9a   :  { %v82_v19 = vpop.f32.mrf.mxu3 }
  0x9b   :  { %v83_v20 = vadd.f32 %v213_v9, %v82_v19 }
  0x9d   :  { %v88_v21 = vmax.f32 %v83_v20, 0.0 }
  0x9f   :  { %201 = vmatmul.msk.f32.gmra.mxu2 %vm90_vm2, %v88_v21 }
 0x106   :  { %v120_v23 = vpop.f32.mrf.mxu1 }
 0x107   :  { %v121_v24 = vadd.f32 %v214_v22, %v120_v23 }
 0x109   :  { %v132_v25 = vand.u32 2147483647, %v121_v24  ;;  %vm162_vm3 = vcmp.gt.f32.partialorder %v121_v24, 0.0 }
 0x10a   :  { %v166_v41 = vsel %vm162_vm3, 1.0, %v246_v40 }
 0x10b   :  { %144 = vrot.lane.b32.xlu2 %v132_v25, %s244_s0  ;;  %136 = vrot.lane.b32.xlu0 %v132_v25, %s245_s23  ;;  %v170_v46 = vsel %vm281_vm8, %v166_v41, %v121_v24 }
 0x10e   :  { %v123_v26 = vpop.f32.mrf.mxu1 }
 0x10f   :  { %v124_v27 = vadd.f32 %v214_v22, %v123_v26 }
 0x111   :  { %v133_v28 = vand.u32 2147483647, %v124_v27  ;;  %vm163_vm9 = vcmp.gt.f32.partialorder %v124_v27, 0.0 }
 0x112   :  { %v167_v50 = vsel %vm163_vm9, 1.0, %v246_v40 }
 0x113   :  { %146 = vrot.lane.b32.xlu2 %v133_v28, %s244_s0  ;;  %138 = vrot.lane.b32.xlu0 %v133_v28, %s245_s23  ;;  %v171_v53 = vsel %vm281_vm8, %v167_v50, %v124_v27 }
 0x11a   :  { %v126_v29 = vpop.f32.mrf.mxu2 }
 0x11b   :  { %v127_v30 = vadd.f32 %v214_v22, %v126_v29 }
 0x11d   :  { %v134_v31 = vand.u32 2147483647, %v127_v30  ;;  %vm164_vm10 = vcmp.gt.f32.partialorder %v127_v30, 0.0 }
 0x11e   :  { %v168_v57 = vsel %vm164_vm10, 1.0, %v246_v40 }
 0x11f   :  { %140 = vrot.lane.b32.xlu1 %v134_v31, %s245_s23  ;;  %148 = vrot.lane.b32.xlu0 %v134_v31, %s244_s0  ;;  %v172_v60 = vsel %vm281_vm8, %v168_v57, %v127_v30 }
 0x122   :  { %v129_v32 = vpop.f32.mrf.mxu2 }
 0x123   :  { %v130_v33 = vadd.f32 %v214_v22, %v129_v32 }
 0x125   :  { %v135_v34 = vand.u32 2147483647, %v130_v33  ;;  %vm165_vm11 = vcmp.gt.f32.partialorder %v130_v33, 0.0 }
 0x126   :  { %v169_v0 = vsel %vm165_vm11, 1.0, %v246_v40 }
 0x127   :  { %142 = vrot.lane.b32.xlu1 %v135_v34, %s245_s23  ;;  %v173_v3 = vsel %vm281_vm8, %v169_v0, %v130_v33 }
 0x12f   :  { %150 = vrot.lane.b32.xlu1 %v135_v34, %s244_s0 }
 0x165   :  { %v145_v38 = vpop.permute.xlu2 %144 }
 0x16d   :  { %v147_v48 = vpop.permute.xlu2 %146 }
 0x17d   :  { %v137_v39 = vpop.permute.xlu0 %136 }
 0x17e   :  { %v152_v42 = vadd.f32 %v145_v38, %v137_v39 }
 0x180   :  { %v176_v45 = vadd.f32 %v152_v42, %v121_v24 }
 0x182   :  { %v180_v47 = vsel %vm277_vm7, %v176_v45, %v170_v46 }
 0x183   :  { %184 = vst [vmem:[%s315_s2] sm:$0xff] %v180_v47 }
 0x185   :  { %v139_v49 = vpop.permute.xlu0 %138 }
 0x186   :  { %v153_v51 = vadd.f32 %v147_v48, %v139_v49 }
 0x188   :  { %v177_v52 = vadd.f32 %v153_v51, %v124_v27 }
 0x18a   :  { %v181_v54 = vsel %vm277_vm7, %v177_v52, %v171_v53 }
 0x18b   :  { %185 = vst [vmem:[%s315_s2 + $0x8] sm:$0xff] %v181_v54 }
 0x191   :  { %v141_v55 = vpop.permute.xlu1 %140  ;;  %v149_v56 = vpop.permute.xlu0 %148 }
 0x192   :  { %v154_v58 = vadd.f32 %v149_v56, %v141_v55 }
 0x194   :  { %v178_v59 = vadd.f32 %v154_v58, %v127_v30 }
 0x196   :  { %v182_v61 = vsel %vm277_vm7, %v178_v59, %v172_v60 }
 0x197   :  { %186 = vst [vmem:[%s315_s2 + $0x10] sm:$0xff] %v182_v61 }
 0x199   :  { %v143_v62 = vpop.permute.xlu1 %142 }
 0x1a1   :  { %v151_v63 = vpop.permute.xlu1 %150 }
 0x1a2   :  { %v155_v1 = vadd.f32 %v151_v63, %v143_v62 }
 0x1a4   :  { %v179_v2 = vadd.f32 %v155_v1, %v130_v33 }
 0x1a6   :  { %v183_v4 = vsel %vm277_vm7, %v179_v2, %v173_v3 }
 0x1a7   :  { %187 = vst [vmem:[%s315_s2 + $0x18] sm:$0xff] %v183_v4 }
 0x1a8   :  { %192 = vsyncpa [#allocation3], 1 }

</bundles_post_ra>
